<compile_context>
chip_gen: v7x
topology: tpu7x:2x2x1
jax: 0.10.0
libtpu: 0.0.40
codegen_flags: <defaults>
</compile_context>

<pallas_src>
import numpy as np
import jax
import jax.numpy as jnp
from jax import lax
from jax.experimental import pallas as pl
from jax.experimental.pallas import tpu as pltpu

# ---- model hyper-params (small, consistent with the module's __init__) ----
N_HEAD = 2
D_MODEL = 32                      # encoder_hidden
D_K = D_MODEL // N_HEAD
D_V = D_K
N_LAYERS = 2                      # encoder_layer
MAX_SEQ_LEN = 32                  # max_seq_len
VOCAB = 41                        # len(symbols) + 1
EPS_LN = 1e-5                     # nn.LayerNorm default inside MultiHeadAttention
NEG_BIG = -1e30                   # finite "minus infinity" for masking


def get_sinusoid_encoding_table(n_position, d_hid, padding_idx=None):
    """Sinusoid position encoding table (same math as the PyTorch reference)."""
    def cal_angle(position, hid_idx):
        return position / np.power(10000, 2 * (hid_idx // 2) / d_hid)

    table = np.array(
        [[cal_angle(pos, j) for j in range(d_hid)] for pos in range(n_position)]
    )
    table[:, 0::2] = np.sin(table[:, 0::2])
    table[:, 1::2] = np.cos(table[:, 1::2])
    if padding_idx is not None:
        table[padding_idx] = 0.0
    return jnp.asarray(table, dtype=jnp.float32)


# ------------------- Pallas kernel: full layer stack, one batch elem / grid step -------------------
def encoder_stack_kernel(x_ref, addm_ref, keepq_ref,
                         wqkv_ref, wo_ref, small_ref,
                         o_ref, head_scratch):
    """
    x_ref     : (1, L, D)        activation slab for this batch element
    addm_ref  : (1, 1, L)        additive key mask (0.0 keep / -1e30 padded)
    keepq_ref : (1, L, 1)        multiplicative query mask (1.0 keep / 0.0 padded)
    wqkv_ref  : (N_LAYERS, D, 3D) fused Q|K|V projection weights
    wo_ref    : (N_LAYERS, D, D)  output projection weights
    small_ref : (N_LAYERS, 2, 3D) row0 = bq|bk|bv ; row1 = bo|gamma|beta
    head_scratch : VMEM (L, D)   per-head outputs written at column offsets
    """
    x = x_ref[0]                       # (L, D)
    addm = addm_ref[0]                 # (1, L)
    keepq = keepq_ref[0]               # (L, 1)
    inv_temp = jnp.float32(1.0 / np.sqrt(D_K))

    for layer in range(N_LAYERS):      # static, unrolled: weights stay in VMEM
        wqkv = wqkv_ref[layer]         # (D, 3D)
        wo = wo_ref[layer]             # (D, D)
        sp = small_ref[layer]          # (2, 3D)
        bqkv = sp[0:1, :]              # (1, 3D)
        bo = sp[1:2, 0:D_MODEL]        # (1, D)
        gamma = sp[1:2, D_MODEL:2 * D_MODEL]
        beta = sp[1:2, 2 * D_MODEL:3 * D_MODEL]

        # fused QKV projection: one MXU push instead of three
        qkv = jnp.dot(x, wqkv, preferred_element_type=jnp.float32) + bqkv   # (L, 3D)

        for h in range(N_HEAD):                       # static unrolled head loop
            qh = qkv[:, h * D_K:(h + 1) * D_K]
            kh = qkv[:, D_MODEL + h * D_K: D_MODEL + (h + 1) * D_K]
            vh = qkv[:, 2 * D_MODEL + h * D_V: 2 * D_MODEL + (h + 1) * D_V]
            # q @ k^T with the transpose folded into the contraction (no XLU transpose)
            scores = lax.dot_general(
                qh, kh, dimension_numbers=(((1,), (1,)), ((), ())),
                preferred_element_type=jnp.float32) * inv_temp              # (L, L)
            scores = scores + addm                    # additive key-padding mask
            m = jnp.max(scores, axis=-1, keepdims=True)
            e = jnp.exp(scores - m)
            denom = jnp.sum(e, axis=-1, keepdims=True)
            attn = e * pl.reciprocal(denom, approx=True)                    # softmax
            head_scratch[:, h * D_V:(h + 1) * D_V] = jnp.dot(
                attn, vh, preferred_element_type=jnp.float32)

        concat = head_scratch[...]                    # (L, H*d_v) == (L, D)
        out = jnp.dot(concat, wo, preferred_element_type=jnp.float32) + bo
        out = out + x                                 # residual (dropout = identity)

        # LayerNorm (biased variance, PyTorch semantics)
        mean = jnp.mean(out, axis=-1, keepdims=True)
        cen = out - mean
        var = jnp.mean(cen * cen, axis=-1, keepdims=True)
        out = cen * lax.rsqrt(var + EPS_LN) * gamma + beta

        # enc_output.masked_fill(mask.unsqueeze(-1), 0)
        x = out * keepq

    o_ref[0] = x


def encoder_layers(x, mask_f, packed_params):
    """Run the full layer stack in a single pallas_call. x:(B,L,D), mask_f:(B,L) float32."""
    B, L, D = x.shape
    wqkv, wo, smalls = packed_params

    # wrapper-side mask precompute (done once, not per layer / per grid step)
    add_key_mask = (mask_f * jnp.float32(NEG_BIG)).reshape(B, 1, L)   # 0 / -1e30
    keep_q = (jnp.float32(1.0) - mask_f).reshape(B, L, 1)             # 1 keep / 0 pad

    def full_spec(shape):
        nd = len(shape)
        return pl.BlockSpec(shape, lambda b, _nd=nd: (0,) * _nd)

    return pl.pallas_call(
        encoder_stack_kernel,
        out_shape=jax.ShapeDtypeStruct((B, L, D), jnp.float32),
        grid=(B,),
        in_specs=[
            pl.BlockSpec((1, L, D), lambda b: (b, 0, 0)),      # activations
            pl.BlockSpec((1, 1, L), lambda b: (b, 0, 0)),      # additive key mask
            pl.BlockSpec((1, L, 1), lambda b: (b, 0, 0)),      # query keep mask
            full_spec(wqkv.shape),                             # (N_LAYERS, D, 3D)
            full_spec(wo.shape),                               # (N_LAYERS, D, D)
            full_spec(smalls.shape),                           # (N_LAYERS, 2, 3D)
        ],
        out_specs=pl.BlockSpec((1, L, D), lambda b: (b, 0, 0)),
        scratch_shapes=[pltpu.VMEM((L, D), jnp.float32)],      # per-head concat buffer
        compiler_params=pltpu.CompilerParams(dimension_semantics=("parallel",)),
    )(x, add_key_mask, keep_q, wqkv, wo, smalls)


# ------------------------- parameter init (deterministic, synthetic) -------------------------
def init_params(key):
    keys = jax.random.split(key, 2 + N_LAYERS * 4)
    emb_table = 0.1 * jax.random.normal(keys[0], (VOCAB, D_MODEL), jnp.float32)
    emb_table = emb_table.at[0].set(0.0)                  # padding_idx = 0
    pos_table = get_sinusoid_encoding_table(MAX_SEQ_LEN + 1, D_MODEL)

    layer_params = []
    for l in range(N_LAYERS):
        k0, k1, k2, k3 = keys[2 + 4 * l: 2 + 4 * l + 4]
        # weights stored as (in, out) so the kernel computes x @ W (== x @ W_pt.T)
        wq = 0.1 * jax.random.normal(k0, (D_MODEL, N_HEAD * D_K), jnp.float32)
        wk = 0.1 * jax.random.normal(k1, (D_MODEL, N_HEAD * D_K), jnp.float32)
        wv = 0.1 * jax.random.normal(k2, (D_MODEL, N_HEAD * D_V), jnp.float32)
        wo = 0.1 * jax.random.normal(k3, (N_HEAD * D_V, D_MODEL), jnp.float32)
        bq = jnp.zeros((1, N_HEAD * D_K), jnp.float32)
        bk = jnp.zeros((1, N_HEAD * D_K), jnp.float32)
        bv = jnp.zeros((1, N_HEAD * D_V), jnp.float32)
        bo = jnp.zeros((1, D_MODEL), jnp.float32)
        gamma = jnp.ones((1, D_MODEL), jnp.float32)
        beta = jnp.zeros((1, D_MODEL), jnp.float32)
        layer_params.append((wq, bq, wk, bk, wv, bv, wo, bo, gamma, beta))
    return emb_table, pos_table, layer_params


def pack_params(layer_params):
    """Stack per-layer weights (leading layer dim) and pack the small (1,32) params."""
    wqkv_l, wo_l, small_l = [], [], []
    for (wq, bq, wk, bk, wv, bv, wo, bo, gamma, beta) in layer_params:
        wqkv_l.append(jnp.concatenate([wq, wk, wv], axis=1))            # (D, 3D)
        wo_l.append(wo)                                                 # (D, D)
        bqkv = jnp.concatenate([bq, bk, bv], axis=1)                    # (1, 3D)
        row1 = jnp.concatenate([bo, gamma, beta], axis=1)               # (1, 3D)
        small_l.append(jnp.concatenate([bqkv, row1], axis=0))           # (2, 3D)
    return jnp.stack(wqkv_l), jnp.stack(wo_l), jnp.stack(small_l)


# ------------------------- Encoder forward (glue + fused Pallas layer stack) -------------------------
def encoder_forward(src_seq, mask, emb_table, pos_table, layer_params):
    B, L = src_seq.shape
    # src_word_emb(src_seq) + position_enc[:, :L, :]  (embedding gather stays in JAX glue)
    enc = jnp.take(emb_table, src_seq, axis=0) + pos_table[:L][None, :, :]
    mask_f = mask.astype(jnp.float32)
    packed = pack_params(layer_params)
    return encoder_layers(enc, mask_f, packed)


# ------------------------- pure-JAX reference (for verification) -------------------------
def ref_encoder_forward(src_seq, mask, emb_table, pos_table, layer_params):
    B, L = src_seq.shape
    x = jnp.take(emb_table, src_seq, axis=0) + pos_table[:L][None, :, :]
    for (wq, bq, wk, bk, wv, bv, wo, bo, gamma, beta) in layer_params:
        residual = x
        q = (x @ wq + bq).reshape(B, L, N_HEAD, D_K).transpose(0, 2, 1, 3)
        k = (x @ wk + bk).reshape(B, L, N_HEAD, D_K).transpose(0, 2, 1, 3)
        v = (x @ wv + bv).reshape(B, L, N_HEAD, D_V).transpose(0, 2, 1, 3)
        scores = jnp.einsum("bhqd,bhkd->bhqk", q, k) / np.sqrt(D_K)
        scores = jnp.where(mask[:, None, None, :], -jnp.inf, scores)
        attn = jax.nn.softmax(scores, axis=-1)
        out = jnp.einsum("bhqk,bhkd->bhqd", attn, v)
        out = out.transpose(0, 2, 1, 3).reshape(B, L, N_HEAD * D_V)
        out = out @ wo + bo
        out = out + residual
        mean = jnp.mean(out, axis=-1, keepdims=True)
        var = jnp.mean((out - mean) ** 2, axis=-1, keepdims=True)
        out = (out - mean) / jnp.sqrt(var + EPS_LN) * gamma + beta
        x = jnp.where(mask[:, :, None], 0.0, out)
    return x


if __name__ == "__main__":
    B, L = 2, 8
    key = jax.random.PRNGKey(0)
    k_param, k_seq = jax.random.split(key)

    emb_table, pos_table, layer_params = init_params(k_param)

    # token ids in [1, VOCAB); pad the tail of each sequence with 0 (PAD)
    src_seq = jax.random.randint(k_seq, (B, L), 1, VOCAB)
    src_seq = src_seq.at[0, 6:].set(0)
    src_seq = src_seq.at[1, 5:].set(0)
    mask = (src_seq == 0)   # True where padded

    out = encoder_forward(src_seq, mask, emb_table, pos_table, layer_params)
    out = jax.block_until_ready(out)

    ref = ref_encoder_forward(src_seq, mask, emb_table, pos_table, layer_params)
    # slightly relaxed tolerance: softmax denominator uses EUP approx reciprocal
    np.testing.assert_allclose(np.asarray(out), np.asarray(ref), rtol=2e-3, atol=1e-3)

    print("KERNEL_OK")
</pallas_src>

<mosaic_0001>
module attributes {stable_mosaic.version = 11 : i64} {
  func.func @encoder_stack_kernel(%arg0: i32, %arg1: memref<1x8x32xf32, #tpu.memory_space<vmem>>, %arg2: memref<1x1x8xf32, #tpu.memory_space<vmem>>, %arg3: memref<1x8x1xf32, #tpu.memory_space<vmem>>, %arg4: memref<2x32x96xf32, #tpu.memory_space<vmem>>, %arg5: memref<2x32x32xf32, #tpu.memory_space<vmem>>, %arg6: memref<2x2x96xf32, #tpu.memory_space<vmem>>, %arg7: memref<1x8x32xf32, #tpu.memory_space<vmem>>, %arg8: memref<8x32xf32, #tpu.memory_space<vmem>>) attributes {dimension_semantics = [#tpu.dimension_semantics<parallel>], iteration_bounds = array<i64: 2>, scalar_prefetch = 0 : i64, scratch_operands = 1 : i64, tpu.core_type = #tpu.core_type<tc>, window_params = [{transform_indices = @transform_0, window_bounds = array<i64: 1, 8, 32>}, {transform_indices = @transform_1, window_bounds = array<i64: 1, 1, 8>}, {transform_indices = @transform_2, window_bounds = array<i64: 1, 8, 1>}, {pipeline_mode = #tpu.pipeline_mode<synchronous>, transform_indices = @transform_3, window_bounds = array<i64: 2, 32, 96>}, {pipeline_mode = #tpu.pipeline_mode<synchronous>, transform_indices = @transform_4, window_bounds = array<i64: 2, 32, 32>}, {pipeline_mode = #tpu.pipeline_mode<synchronous>, transform_indices = @transform_5, window_bounds = array<i64: 2, 2, 96>}, {transform_indices = @transform_6, window_bounds = array<i64: 1, 8, 32>}]} {
    %c0 = arith.constant 0 : index
    %c0_0 = arith.constant 0 : index
    %c0_1 = arith.constant 0 : index
    %0 = vector.load %arg1[%c0, %c0_0, %c0_1] : memref<1x8x32xf32, #tpu.memory_space<vmem>>, vector<1x8x32xf32>
    %1 = vector.shape_cast %0 : vector<1x8x32xf32> to vector<8x32xf32>
    %c0_2 = arith.constant 0 : index
    %c0_3 = arith.constant 0 : index
    %c0_4 = arith.constant 0 : index
    %2 = vector.load %arg2[%c0_2, %c0_3, %c0_4] : memref<1x1x8xf32, #tpu.memory_space<vmem>>, vector<1x1x8xf32>
    %3 = vector.shape_cast %2 : vector<1x1x8xf32> to vector<1x8xf32>
    %c0_5 = arith.constant 0 : index
    %c0_6 = arith.constant 0 : index
    %c0_7 = arith.constant 0 : index
    %4 = vector.load %arg3[%c0_5, %c0_6, %c0_7] : memref<1x8x1xf32, #tpu.memory_space<vmem>>, vector<1x8x1xf32>
    %5 = vector.shape_cast %4 : vector<1x8x1xf32> to vector<8x1xf32>
    %c0_8 = arith.constant 0 : index
    %c0_9 = arith.constant 0 : index
    %c0_10 = arith.constant 0 : index
    %6 = vector.load %arg4[%c0_8, %c0_9, %c0_10] : memref<2x32x96xf32, #tpu.memory_space<vmem>>, vector<1x32x96xf32>
    %7 = vector.shape_cast %6 : vector<1x32x96xf32> to vector<32x96xf32>
    %c0_11 = arith.constant 0 : index
    %c0_12 = arith.constant 0 : index
    %c0_13 = arith.constant 0 : index
    %8 = vector.load %arg5[%c0_11, %c0_12, %c0_13] : memref<2x32x32xf32, #tpu.memory_space<vmem>>, vector<1x32x32xf32>
    %9 = vector.shape_cast %8 : vector<1x32x32xf32> to vector<32x32xf32>
    %c0_14 = arith.constant 0 : index
    %c0_15 = arith.constant 0 : index
    %c0_16 = arith.constant 0 : index
    %10 = vector.load %arg6[%c0_14, %c0_15, %c0_16] : memref<2x2x96xf32, #tpu.memory_space<vmem>>, vector<1x2x96xf32>
    %11 = vector.shape_cast %10 : vector<1x2x96xf32> to vector<2x96xf32>
    %12 = vector.extract_strided_slice %11 {offsets = [0, 0], sizes = [1, 96], strides = [1, 1]} : vector<2x96xf32> to vector<1x96xf32>
    %13 = vector.extract_strided_slice %11 {offsets = [1, 0], sizes = [1, 32], strides = [1, 1]} : vector<2x96xf32> to vector<1x32xf32>
    %14 = vector.extract_strided_slice %11 {offsets = [1, 32], sizes = [1, 32], strides = [1, 1]} : vector<2x96xf32> to vector<1x32xf32>
    %15 = vector.extract_strided_slice %11 {offsets = [1, 64], sizes = [1, 32], strides = [1, 1]} : vector<2x96xf32> to vector<1x32xf32>
    %cst = arith.constant dense<0.000000e+00> : vector<8x96xf32>
    %16 = tpu.matmul %1, %7, %cst {dimension_numbers = #tpu.dot_dimension_numbers<[1], [0], [0], [1], [0, 0, 1, 1], [], []>} : vector<8x32xf32>, vector<32x96xf32>, vector<8x96xf32> -> vector<8x96xf32>
    %17 = vector.broadcast %12 : vector<1x96xf32> to vector<8x96xf32>
    %18 = arith.addf %16, %17 : vector<8x96xf32>
    %19 = vector.extract_strided_slice %18 {offsets = [0, 0], sizes = [8, 16], strides = [1, 1]} : vector<8x96xf32> to vector<8x16xf32>
    %20 = vector.extract_strided_slice %18 {offsets = [0, 32], sizes = [8, 16], strides = [1, 1]} : vector<8x96xf32> to vector<8x16xf32>
    %21 = vector.extract_strided_slice %18 {offsets = [0, 64], sizes = [8, 16], strides = [1, 1]} : vector<8x96xf32> to vector<8x16xf32>
    %cst_17 = arith.constant dense<0.000000e+00> : vector<8x8xf32>
    %22 = tpu.matmul %19, %20, %cst_17 {dimension_numbers = #tpu.dot_dimension_numbers<[1], [1], [0], [0], [0, 0, 1, 0], [], []>} : vector<8x16xf32>, vector<8x16xf32>, vector<8x8xf32> -> vector<8x8xf32>
    %cst_18 = arith.constant 2.500000e-01 : f32
    %23 = vector.broadcast %cst_18 : f32 to vector<8x8xf32>
    %24 = arith.mulf %22, %23 : vector<8x8xf32>
    %25 = vector.broadcast %3 : vector<1x8xf32> to vector<8x8xf32>
    %26 = arith.addf %24, %25 : vector<8x8xf32>
    %cst_19 = arith.constant dense<0xFF800000> : vector<8xf32>
    %27 = vector.multi_reduction <maximumf>, %26, %cst_19 [1] : vector<8x8xf32> to vector<8xf32>
    %28 = vector.shape_cast %27 : vector<8xf32> to vector<8x1xf32>
    %29 = vector.broadcast %28 : vector<8x1xf32> to vector<8x8xf32>
    %30 = arith.subf %26, %29 : vector<8x8xf32>
    %31 = math.exp %30 : vector<8x8xf32>
    %cst_20 = arith.constant dense<0.000000e+00> : vector<8xf32>
    %32 = vector.multi_reduction <add>, %31, %cst_20 [1] : vector<8x8xf32> to vector<8xf32>
    %33 = vector.shape_cast %32 : vector<8xf32> to vector<8x1xf32>
    %34 = tpu.reciprocal %33 {approx = true} : vector<8x1xf32> -> vector<8x1xf32>
    %35 = vector.broadcast %34 : vector<8x1xf32> to vector<8x8xf32>
    %36 = arith.mulf %31, %35 : vector<8x8xf32>
    %cst_21 = arith.constant dense<0.000000e+00> : vector<8x16xf32>
    %37 = tpu.matmul %36, %21, %cst_21 {dimension_numbers = #tpu.dot_dimension_numbers<[1], [0], [0], [1], [0, 0, 1, 1], [], []>} : vector<8x8xf32>, vector<8x16xf32>, vector<8x16xf32> -> vector<8x16xf32>
    %c0_22 = arith.constant 0 : index
    %c0_23 = arith.constant 0 : index
    %38 = vector.load %arg8[%c0_22, %c0_23] : memref<8x32xf32, #tpu.memory_space<vmem>>, vector<8x16xf32>
    tpu.vector_store %arg8[%c0_22, %c0_23], %37 {strides = array<i32>} : memref<8x32xf32, #tpu.memory_space<vmem>>, vector<8x16xf32>,
    %39 = vector.extract_strided_slice %18 {offsets = [0, 16], sizes = [8, 16], strides = [1, 1]} : vector<8x96xf32> to vector<8x16xf32>
    %40 = vector.extract_strided_slice %18 {offsets = [0, 48], sizes = [8, 16], strides = [1, 1]} : vector<8x96xf32> to vector<8x16xf32>
    %41 = vector.extract_strided_slice %18 {offsets = [0, 80], sizes = [8, 16], strides = [1, 1]} : vector<8x96xf32> to vector<8x16xf32>
    %cst_24 = arith.constant dense<0.000000e+00> : vector<8x8xf32>
    %42 = tpu.matmul %39, %40, %cst_24 {dimension_numbers = #tpu.dot_dimension_numbers<[1], [1], [0], [0], [0, 0, 1, 0], [], []>} : vector<8x16xf32>, vector<8x16xf32>, vector<8x8xf32> -> vector<8x8xf32>
    %cst_25 = arith.constant 2.500000e-01 : f32
    %43 = vector.broadcast %cst_25 : f32 to vector<8x8xf32>
    %44 = arith.mulf %42, %43 : vector<8x8xf32>
    %45 = vector.broadcast %3 : vector<1x8xf32> to vector<8x8xf32>
    %46 = arith.addf %44, %45 : vector<8x8xf32>
    %cst_26 = arith.constant dense<0xFF800000> : vector<8xf32>
    %47 = vector.multi_reduction <maximumf>, %46, %cst_26 [1] : vector<8x8xf32> to vector<8xf32>
    %48 = vector.shape_cast %47 : vector<8xf32> to vector<8x1xf32>
    %49 = vector.broadcast %48 : vector<8x1xf32> to vector<8x8xf32>
    %50 = arith.subf %46, %49 : vector<8x8xf32>
    %51 = math.exp %50 : vector<8x8xf32>
    %cst_27 = arith.constant dense<0.000000e+00> : vector<8xf32>
    %52 = vector.multi_reduction <add>, %51, %cst_27 [1] : vector<8x8xf32> to vector<8xf32>
    %53 = vector.shape_cast %52 : vector<8xf32> to vector<8x1xf32>
    %54 = tpu.reciprocal %53 {approx = true} : vector<8x1xf32> -> vector<8x1xf32>
    %55 = vector.broadcast %54 : vector<8x1xf32> to vector<8x8xf32>
    %56 = arith.mulf %51, %55 : vector<8x8xf32>
    %cst_28 = arith.constant dense<0.000000e+00> : vector<8x16xf32>
    %57 = tpu.matmul %56, %41, %cst_28 {dimension_numbers = #tpu.dot_dimension_numbers<[1], [0], [0], [1], [0, 0, 1, 1], [], []>} : vector<8x8xf32>, vector<8x16xf32>, vector<8x16xf32> -> vector<8x16xf32>
    %c0_29 = arith.constant 0 : index
    %c16 = arith.constant 16 : index
    %58 = vector.load %arg8[%c0_29, %c16] : memref<8x32xf32, #tpu.memory_space<vmem>>, vector<8x16xf32>
    tpu.vector_store %arg8[%c0_29, %c16], %57 {strides = array<i32>} : memref<8x32xf32, #tpu.memory_space<vmem>>, vector<8x16xf32>,
    %c0_30 = arith.constant 0 : index
    %c0_31 = arith.constant 0 : index
    %59 = vector.load %arg8[%c0_30, %c0_31] : memref<8x32xf32, #tpu.memory_space<vmem>>, vector<8x32xf32>
    %cst_32 = arith.constant dense<0.000000e+00> : vector<8x32xf32>
    %60 = tpu.matmul %59, %9, %cst_32 {dimension_numbers = #tpu.dot_dimension_numbers<[1], [0], [0], [1], [0, 0, 1, 1], [], []>} : vector<8x32xf32>, vector<32x32xf32>, vector<8x32xf32> -> vector<8x32xf32>
    %61 = vector.broadcast %13 : vector<1x32xf32> to vector<8x32xf32>
    %62 = arith.addf %60, %61 : vector<8x32xf32>
    %63 = arith.addf %62, %1 : vector<8x32xf32>
    %cst_33 = arith.constant dense<0.000000e+00> : vector<8xf32>
    %64 = vector.multi_reduction <add>, %63, %cst_33 [1] : vector<8x32xf32> to vector<8xf32>
    %65 = vector.shape_cast %64 : vector<8xf32> to vector<8x1xf32>
    %cst_34 = arith.constant 3.200000e+01 : f32
    %66 = vector.broadcast %cst_34 : f32 to vector<8x1xf32>
    %67 = arith.divf %65, %66 : vector<8x1xf32>
    %68 = vector.broadcast %67 : vector<8x1xf32> to vector<8x32xf32>
    %69 = arith.subf %63, %68 : vector<8x32xf32>
    %70 = arith.mulf %69, %69 : vector<8x32xf32>
    %cst_35 = arith.constant dense<0.000000e+00> : vector<8xf32>
    %71 = vector.multi_reduction <add>, %70, %cst_35 [1] : vector<8x32xf32> to vector<8xf32>
    %72 = vector.shape_cast %71 : vector<8xf32> to vector<8x1xf32>
    %cst_36 = arith.constant 3.200000e+01 : f32
    %73 = vector.broadcast %cst_36 : f32 to vector<8x1xf32>
    %74 = arith.divf %72, %73 : vector<8x1xf32>
    %cst_37 = arith.constant 9.99999974E-6 : f32
    %75 = vector.broadcast %cst_37 : f32 to vector<8x1xf32>
    %76 = arith.addf %74, %75 : vector<8x1xf32>
    %77 = math.rsqrt %76 : vector<8x1xf32>
    %78 = vector.broadcast %77 : vector<8x1xf32> to vector<8x32xf32>
    %79 = arith.mulf %69, %78 : vector<8x32xf32>
    %80 = vector.broadcast %14 : vector<1x32xf32> to vector<8x32xf32>
    %81 = arith.mulf %79, %80 : vector<8x32xf32>
    %82 = vector.broadcast %15 : vector<1x32xf32> to vector<8x32xf32>
    %83 = arith.addf %81, %82 : vector<8x32xf32>
    %84 = vector.broadcast %5 : vector<8x1xf32> to vector<8x32xf32>
    %85 = arith.mulf %83, %84 : vector<8x32xf32>
    %c1 = arith.constant 1 : index
    %c0_38 = arith.constant 0 : index
    %c0_39 = arith.constant 0 : index
    %86 = vector.load %arg4[%c1, %c0_38, %c0_39] : memref<2x32x96xf32, #tpu.memory_space<vmem>>, vector<1x32x96xf32>
    %87 = vector.shape_cast %86 : vector<1x32x96xf32> to vector<32x96xf32>
    %c1_40 = arith.constant 1 : index
    %c0_41 = arith.constant 0 : index
    %c0_42 = arith.constant 0 : index
    %88 = vector.load %arg5[%c1_40, %c0_41, %c0_42] : memref<2x32x32xf32, #tpu.memory_space<vmem>>, vector<1x32x32xf32>
    %89 = vector.shape_cast %88 : vector<1x32x32xf32> to vector<32x32xf32>
    %c1_43 = arith.constant 1 : index
    %c0_44 = arith.constant 0 : index
    %c0_45 = arith.constant 0 : index
    %90 = vector.load %arg6[%c1_43, %c0_44, %c0_45] : memref<2x2x96xf32, #tpu.memory_space<vmem>>, vector<1x2x96xf32>
    %91 = vector.shape_cast %90 : vector<1x2x96xf32> to vector<2x96xf32>
    %92 = vector.extract_strided_slice %91 {offsets = [0, 0], sizes = [1, 96], strides = [1, 1]} : vector<2x96xf32> to vector<1x96xf32>
    %93 = vector.extract_strided_slice %91 {offsets = [1, 0], sizes = [1, 32], strides = [1, 1]} : vector<2x96xf32> to vector<1x32xf32>
    %94 = vector.extract_strided_slice %91 {offsets = [1, 32], sizes = [1, 32], strides = [1, 1]} : vector<2x96xf32> to vector<1x32xf32>
    %95 = vector.extract_strided_slice %91 {offsets = [1, 64], sizes = [1, 32], strides = [1, 1]} : vector<2x96xf32> to vector<1x32xf32>
    %cst_46 = arith.constant dense<0.000000e+00> : vector<8x96xf32>
    %96 = tpu.matmul %85, %87, %cst_46 {dimension_numbers = #tpu.dot_dimension_numbers<[1], [0], [0], [1], [0, 0, 1, 1], [], []>} : vector<8x32xf32>, vector<32x96xf32>, vector<8x96xf32> -> vector<8x96xf32>
    %97 = vector.broadcast %92 : vector<1x96xf32> to vector<8x96xf32>
    %98 = arith.addf %96, %97 : vector<8x96xf32>
    %99 = vector.extract_strided_slice %98 {offsets = [0, 0], sizes = [8, 16], strides = [1, 1]} : vector<8x96xf32> to vector<8x16xf32>
    %100 = vector.extract_strided_slice %98 {offsets = [0, 32], sizes = [8, 16], strides = [1, 1]} : vector<8x96xf32> to vector<8x16xf32>
    %101 = vector.extract_strided_slice %98 {offsets = [0, 64], sizes = [8, 16], strides = [1, 1]} : vector<8x96xf32> to vector<8x16xf32>
    %cst_47 = arith.constant dense<0.000000e+00> : vector<8x8xf32>
    %102 = tpu.matmul %99, %100, %cst_47 {dimension_numbers = #tpu.dot_dimension_numbers<[1], [1], [0], [0], [0, 0, 1, 0], [], []>} : vector<8x16xf32>, vector<8x16xf32>, vector<8x8xf32> -> vector<8x8xf32>
    %cst_48 = arith.constant 2.500000e-01 : f32
    %103 = vector.broadcast %cst_48 : f32 to vector<8x8xf32>
    %104 = arith.mulf %102, %103 : vector<8x8xf32>
    %105 = vector.broadcast %3 : vector<1x8xf32> to vector<8x8xf32>
    %106 = arith.addf %104, %105 : vector<8x8xf32>
    %cst_49 = arith.constant dense<0xFF800000> : vector<8xf32>
    %107 = vector.multi_reduction <maximumf>, %106, %cst_49 [1] : vector<8x8xf32> to vector<8xf32>
    %108 = vector.shape_cast %107 : vector<8xf32> to vector<8x1xf32>
    %109 = vector.broadcast %108 : vector<8x1xf32> to vector<8x8xf32>
    %110 = arith.subf %106, %109 : vector<8x8xf32>
    %111 = math.exp %110 : vector<8x8xf32>
    %cst_50 = arith.constant dense<0.000000e+00> : vector<8xf32>
    %112 = vector.multi_reduction <add>, %111, %cst_50 [1] : vector<8x8xf32> to vector<8xf32>
    %113 = vector.shape_cast %112 : vector<8xf32> to vector<8x1xf32>
    %114 = tpu.reciprocal %113 {approx = true} : vector<8x1xf32> -> vector<8x1xf32>
    %115 = vector.broadcast %114 : vector<8x1xf32> to vector<8x8xf32>
    %116 = arith.mulf %111, %115 : vector<8x8xf32>
    %cst_51 = arith.constant dense<0.000000e+00> : vector<8x16xf32>
    %117 = tpu.matmul %116, %101, %cst_51 {dimension_numbers = #tpu.dot_dimension_numbers<[1], [0], [0], [1], [0, 0, 1, 1], [], []>} : vector<8x8xf32>, vector<8x16xf32>, vector<8x16xf32> -> vector<8x16xf32>
    %c0_52 = arith.constant 0 : index
    %c0_53 = arith.constant 0 : index
    %118 = vector.load %arg8[%c0_52, %c0_53] : memref<8x32xf32, #tpu.memory_space<vmem>>, vector<8x16xf32>
    tpu.vector_store %arg8[%c0_52, %c0_53], %117 {strides = array<i32>} : memref<8x32xf32, #tpu.memory_space<vmem>>, vector<8x16xf32>,
    %119 = vector.extract_strided_slice %98 {offsets = [0, 16], sizes = [8, 16], strides = [1, 1]} : vector<8x96xf32> to vector<8x16xf32>
    %120 = vector.extract_strided_slice %98 {offsets = [0, 48], sizes = [8, 16], strides = [1, 1]} : vector<8x96xf32> to vector<8x16xf32>
    %121 = vector.extract_strided_slice %98 {offsets = [0, 80], sizes = [8, 16], strides = [1, 1]} : vector<8x96xf32> to vector<8x16xf32>
    %cst_54 = arith.constant dense<0.000000e+00> : vector<8x8xf32>
    %122 = tpu.matmul %119, %120, %cst_54 {dimension_numbers = #tpu.dot_dimension_numbers<[1], [1], [0], [0], [0, 0, 1, 0], [], []>} : vector<8x16xf32>, vector<8x16xf32>, vector<8x8xf32> -> vector<8x8xf32>
    %cst_55 = arith.constant 2.500000e-01 : f32
    %123 = vector.broadcast %cst_55 : f32 to vector<8x8xf32>
    %124 = arith.mulf %122, %123 : vector<8x8xf32>
    %125 = vector.broadcast %3 : vector<1x8xf32> to vector<8x8xf32>
    %126 = arith.addf %124, %125 : vector<8x8xf32>
    %cst_56 = arith.constant dense<0xFF800000> : vector<8xf32>
    %127 = vector.multi_reduction <maximumf>, %126, %cst_56 [1] : vector<8x8xf32> to vector<8xf32>
    %128 = vector.shape_cast %127 : vector<8xf32> to vector<8x1xf32>
    %129 = vector.broadcast %128 : vector<8x1xf32> to vector<8x8xf32>
    %130 = arith.subf %126, %129 : vector<8x8xf32>
    %131 = math.exp %130 : vector<8x8xf32>
    %cst_57 = arith.constant dense<0.000000e+00> : vector<8xf32>
    %132 = vector.multi_reduction <add>, %131, %cst_57 [1] : vector<8x8xf32> to vector<8xf32>
    %133 = vector.shape_cast %132 : vector<8xf32> to vector<8x1xf32>
    %134 = tpu.reciprocal %133 {approx = true} : vector<8x1xf32> -> vector<8x1xf32>
    %135 = vector.broadcast %134 : vector<8x1xf32> to vector<8x8xf32>
    %136 = arith.mulf %131, %135 : vector<8x8xf32>
    %cst_58 = arith.constant dense<0.000000e+00> : vector<8x16xf32>
    %137 = tpu.matmul %136, %121, %cst_58 {dimension_numbers = #tpu.dot_dimension_numbers<[1], [0], [0], [1], [0, 0, 1, 1], [], []>} : vector<8x8xf32>, vector<8x16xf32>, vector<8x16xf32> -> vector<8x16xf32>
    %c0_59 = arith.constant 0 : index
    %c16_60 = arith.constant 16 : index
    %138 = vector.load %arg8[%c0_59, %c16_60] : memref<8x32xf32, #tpu.memory_space<vmem>>, vector<8x16xf32>
    tpu.vector_store %arg8[%c0_59, %c16_60], %137 {strides = array<i32>} : memref<8x32xf32, #tpu.memory_space<vmem>>, vector<8x16xf32>,
    %c0_61 = arith.constant 0 : index
    %c0_62 = arith.constant 0 : index
    %139 = vector.load %arg8[%c0_61, %c0_62] : memref<8x32xf32, #tpu.memory_space<vmem>>, vector<8x32xf32>
    %cst_63 = arith.constant dense<0.000000e+00> : vector<8x32xf32>
    %140 = tpu.matmul %139, %89, %cst_63 {dimension_numbers = #tpu.dot_dimension_numbers<[1], [0], [0], [1], [0, 0, 1, 1], [], []>} : vector<8x32xf32>, vector<32x32xf32>, vector<8x32xf32> -> vector<8x32xf32>
    %141 = vector.broadcast %93 : vector<1x32xf32> to vector<8x32xf32>
    %142 = arith.addf %140, %141 : vector<8x32xf32>
    %143 = arith.addf %142, %85 : vector<8x32xf32>
    %cst_64 = arith.constant dense<0.000000e+00> : vector<8xf32>
    %144 = vector.multi_reduction <add>, %143, %cst_64 [1] : vector<8x32xf32> to vector<8xf32>
    %145 = vector.shape_cast %144 : vector<8xf32> to vector<8x1xf32>
    %cst_65 = arith.constant 3.200000e+01 : f32
    %146 = vector.broadcast %cst_65 : f32 to vector<8x1xf32>
    %147 = arith.divf %145, %146 : vector<8x1xf32>
    %148 = vector.broadcast %147 : vector<8x1xf32> to vector<8x32xf32>
    %149 = arith.subf %143, %148 : vector<8x32xf32>
    %150 = arith.mulf %149, %149 : vector<8x32xf32>
    %cst_66 = arith.constant dense<0.000000e+00> : vector<8xf32>
    %151 = vector.multi_reduction <add>, %150, %cst_66 [1] : vector<8x32xf32> to vector<8xf32>
    %152 = vector.shape_cast %151 : vector<8xf32> to vector<8x1xf32>
    %cst_67 = arith.constant 3.200000e+01 : f32
    %153 = vector.broadcast %cst_67 : f32 to vector<8x1xf32>
    %154 = arith.divf %152, %153 : vector<8x1xf32>
    %cst_68 = arith.constant 9.99999974E-6 : f32
    %155 = vector.broadcast %cst_68 : f32 to vector<8x1xf32>
    %156 = arith.addf %154, %155 : vector<8x1xf32>
    %157 = math.rsqrt %156 : vector<8x1xf32>
    %158 = vector.broadcast %157 : vector<8x1xf32> to vector<8x32xf32>
    %159 = arith.mulf %149, %158 : vector<8x32xf32>
    %160 = vector.broadcast %94 : vector<1x32xf32> to vector<8x32xf32>
    %161 = arith.mulf %159, %160 : vector<8x32xf32>
    %162 = vector.broadcast %95 : vector<1x32xf32> to vector<8x32xf32>
    %163 = arith.addf %161, %162 : vector<8x32xf32>
    %164 = vector.broadcast %5 : vector<8x1xf32> to vector<8x32xf32>
    %165 = arith.mulf %163, %164 : vector<8x32xf32>
    %c0_69 = arith.constant 0 : index
    %c0_70 = arith.constant 0 : index
    %c0_71 = arith.constant 0 : index
    %166 = vector.load %arg7[%c0_69, %c0_70, %c0_71] : memref<1x8x32xf32, #tpu.memory_space<vmem>>, vector<1x8x32xf32>
    %167 = vector.shape_cast %166 : vector<1x8x32xf32> to vector<8x32xf32>
    %168 = vector.shape_cast %165 : vector<8x32xf32> to vector<1x8x32xf32>
    tpu.vector_store %arg7[%c0_69, %c0_70, %c0_71], %168 {strides = array<i32>} : memref<1x8x32xf32, #tpu.memory_space<vmem>>, vector<1x8x32xf32>,
    return
  }
  func.func @transform_0(%arg0: i32) -> (i32, i32, i32) {
    %c0_i32 = arith.constant 0 : i32
    %c0_i32_0 = arith.constant 0 : i32
    %c0_i32_1 = arith.constant 0 : i32
    return %arg0, %c0_i32, %c0_i32_0 : i32, i32, i32
  }
  func.func @transform_1(%arg0: i32) -> (i32, i32, i32) {
    %c0_i32 = arith.constant 0 : i32
    %c0_i32_0 = arith.constant 0 : i32
    %c0_i32_1 = arith.constant 0 : i32
    return %arg0, %c0_i32, %c0_i32_0 : i32, i32, i32
  }
  func.func @transform_2(%arg0: i32) -> (i32, i32, i32) {
    %c0_i32 = arith.constant 0 : i32
    %c0_i32_0 = arith.constant 0 : i32
    %c0_i32_1 = arith.constant 0 : i32
    return %arg0, %c0_i32, %c0_i32_0 : i32, i32, i32
  }
  func.func @transform_3(%arg0: i32) -> (i32, i32, i32) {
    %c0_i32 = arith.constant 0 : i32
    %c0_i32_0 = arith.constant 0 : i32
    %c0_i32_1 = arith.constant 0 : i32
    %c0_i32_2 = arith.constant 0 : i32
    return %c0_i32, %c0_i32_0, %c0_i32_1 : i32, i32, i32
  }
  func.func @transform_4(%arg0: i32) -> (i32, i32, i32) {
    %c0_i32 = arith.constant 0 : i32
    %c0_i32_0 = arith.constant 0 : i32
    %c0_i32_1 = arith.constant 0 : i32
    %c0_i32_2 = arith.constant 0 : i32
    return %c0_i32, %c0_i32_0, %c0_i32_1 : i32, i32, i32
  }
  func.func @transform_5(%arg0: i32) -> (i32, i32, i32) {
    %c0_i32 = arith.constant 0 : i32
    %c0_i32_0 = arith.constant 0 : i32
    %c0_i32_1 = arith.constant 0 : i32
    %c0_i32_2 = arith.constant 0 : i32
    return %c0_i32, %c0_i32_0, %c0_i32_1 : i32, i32, i32
  }
  func.func @transform_6(%arg0: i32) -> (i32, i32, i32) {
    %c0_i32 = arith.constant 0 : i32
    %c0_i32_0 = arith.constant 0 : i32
    %c0_i32_1 = arith.constant 0 : i32
    return %arg0, %c0_i32, %c0_i32_0 : i32, i32, i32
  }
}

</mosaic_0001>

<bundles_post_ra>
// kernel: tpu_custom_call.1
= control target key start
LH: loop header
LB: loop body
LE: loop exit
PB: predicated region body
PF: predicated region fallthrough
CT: control target
= control target key end

     0   :  { %11 = vsyncpa [#allocation4], 0  ;;  %s2396_s0 = inlined_call_operand.vmem [shape: f32[2,8,32], index: 0, kind: input, shape index: {}]   ;;  %s2397_s1 = inlined_call_operand.hbm [shape: f32[2,1,8], index: 1, kind: input, shape index: {}]   ;;  %s2398_s2 = inlined_call_operand.vmem [shape: f32[2,8,1], index: 2, kind: input, shape index: {}]   ;;  %s2399_s3 = inlined_call_operand.hbm [shape: f32[2,32,96], index: 3, kind: input, shape index: {}]   ;;  %s2400_s4 = inlined_call_operand.hbm [shape: f32[2,32,32], index: 4, kind: input, shape index: {}]   ;;  %s2401_s5 = inlined_call_operand.vmem [shape: f32[2,2,96], index: 5, kind: input, shape index: {}]   ;;  %s2402_s6 = inlined_call_operand.hbm [shape: f32[2,8,32], index: 6, kind: output, shape index: {}]  }
   0x1   :  { %13 = vsyncpa [#allocation4 + $0x1], 0 }
   0x2   :  { %14 = vsyncpa [#allocation7], 0 }
   0x3   :  { %15 = vsyncpa [#allocation5], 0 }
   0x4   :  { %17 = vsyncpa [#allocation5 + $0x1], 0  ;;  %s2016_s21 = smov 0   ;;  %s2018_s22 = smov 0  }
   0x5   :  { %s2020_s23 = smov 0   ;;  %s2022_s24 = smov 0  }
   0x6 LB: > { %s2037_s25 = sadd.s32 4294967295, %s1963_s24   ;;  %s1528_s26 = sadd.s32 4294967294, %s1963_s24   ;;  %s1963_s24 = sphi %s2022_s24, %s2422_s24   ;;  %s1959_s23 = sphi %s2020_s23, %s2421_s23   ;;  %s1955_s22 = sphi %s2018_s22, %s2420_s22   ;;  %s1951_s21 = sphi %s2016_s21, %s2419_s21  }
   0x7   : > { %p69_p0 = scmp.ne.s32.totalorder %s1955_s22, %s1951_s21  ;;  %p2403_p1 = scmp.eq.s32.totalorder %s2037_s25, 0 }
   0x8   : > { %p188_p3 = scmp.eq.s32.totalorder %s1528_s26, 1  ;;  %p1529_p5 = scmp.ge.s32.totalorder %s1963_s24, 1 }
   0x9   : > { %p2046_p4 = por %p2403_p1, %p69_p0  ;;  %p195_p7 = scmp.lt.s32.totalorder %s1963_s24, 3 }
   0xa   : > { %p2051_p6 = por %p188_p3, %p69_p0  ;;  %s1965_s30 = smov [#allocation6]  }
   0xb   : > { %s2406_s27 = scalar_select %p2046_p4, 1, 0 }
   0xc   : > { %s2407_s28 = scalar_select %p2051_p6, 1, 0 }
   0xd   : > { %p2056_p8 = pnand %p1529_p5, %p195_p7  ;;  %s207_s7 = sshll.u32 %s1965_s30, 4  ;;  %s2060_s7 = int_to_ptr.vmem [resolvable:$true] %s207_s7 }
   0xe   : > { %s1966_s9 = smov [#allocation8]   ;;  %s1807_s13 = scalar_lea.hbm %s2399_s3, 1024 }
   0xf   : > { %p1718_p9 = pneg %p2056_p8  ;;  %s220_s10 = sshll.u32 %s1966_s9, 4  ;;  %s2071_s10 = int_to_ptr.vmem [resolvable:$true] %s220_s10 }
  0x10   : > { %p1808_p12 = scmp.ne.s32.totalorder %s2399_s3, %s1807_s13  ;;  %p1814_p5 = scmp.lt.u32.totalorder %s1807_s13, %s2399_s3 }
  0x11   : > { %p2067_p11 = pnand %p1718_p9, %p2403_p1 }
  0x13   : > { %p1809_p13 = pneg %p2067_p11 }
  0x15   : > { %p1810_p0 = pnand %p1809_p13, %p1808_p12 }
  0x17   : > { %p1811_p3 = pneg %p1810_p0 }
  0x19   : > { %p1816_p7 = pnand %p1814_p5, %p1811_p3 }
  0x1b   : > { %1819 = shalt.err (!%p1816_p7)
}
  0x1c   : > { %s1820_s18 = scalar_lea.vmem %s2060_s7, 1024  ;;  %p1828_p2 = scmp.lt.s32.totalorder %s2060_s7, %s2060_s7 }
  0x1d   : > { %p1821_p9 = scmp.ne.s32.totalorder %s2060_s7, %s1820_s18  ;;  %p1829_p12 = scmp.lt.s32.totalorder %s1820_s18, %s1820_s18 }
  0x1f   : > { %p1823_p10 = pnand %p1821_p9, %p1809_p13  ;;  %p1830_p0 = por %p1829_p12, %p1828_p2 }
  0x21   : > { %p1824_p1 = pneg %p1823_p10 }
  0x23   : > { %p1831_p6 = pnand %p1830_p0, %p1824_p1 }
  0x25   : > { %1834 = shalt.err (!%p1831_p6)
}
  0x26   : > { %s1967_s19 = smov 128   ;;  %s1968_s20 = smov 8  }
  0x27   : > { %1721 = dma.hbm_to_vmem [thread:$0]  (!%p2067_p11), %s2399_s3, 1024, %s2060_s7, [#allocation7], %s1967_s19, %s1967_s19, %s1968_s20  }
  0x28   : > { %s1835_s12 = scalar_lea.hbm %s2400_s4, 1024 }
  0x29   : > { %p1836_p2 = scmp.ne.s32.totalorder %s2400_s4, %s1835_s12  ;;  %p1842_p10 = scmp.lt.u32.totalorder %s1835_s12, %s2400_s4 }
  0x2b   : > { %p1838_p1 = pnand %p1836_p2, %p1809_p13 }
  0x2d   : > { %p1839_p6 = pneg %p1838_p1 }
  0x2f   : > { %p1844_p3 = pnand %p1842_p10, %p1839_p6 }
  0x31   : > { %1847 = shalt.err (!%p1844_p3)
}
  0x32   : > { %s1848_s7 = scalar_lea.vmem %s2071_s10, 1024  ;;  %p1856_p12 = scmp.lt.s32.totalorder %s2071_s10, %s2071_s10 }
  0x33   : > { %p1849_p5 = scmp.ne.s32.totalorder %s2071_s10, %s1848_s7  ;;  %p1857_p0 = scmp.lt.s32.totalorder %s1848_s7, %s1848_s7 }
  0x35   : > { %p1851_p7 = pnand %p1849_p5, %p1809_p13  ;;  %p1858_p2 = por %p1857_p0, %p1856_p12 }
  0x37   : > { %p1852_p9 = pneg %p1851_p7 }
  0x39   : > { %p1859_p1 = pnand %p1858_p2, %p1852_p9 }
  0x3b   : > { %1862 = shalt.err (!%p1859_p1)
}
  0x3c   : > { %1724 = dma.hbm_to_vmem [thread:$0]  (!%p2067_p11), %s2400_s4, 1024, %s2071_s10, [#allocation7], %s1967_s19, %s1967_s19, %s1968_s20  }
  0x3d   : > { %s2126_s26 = sadd.s32 1, %s1963_s24   ;;  %s56_s8 = sadd.s32 1, %s1959_s23 }
  0x3e   : > { %s53_s30 = ssub.s32 %s1963_s24, %s2126_s26  ;;  %p63_p13 = scmp.ne.s32.totalorder %s1959_s23, %s1955_s22 }
  0x3f   : > { %p54_p6 = scmp.eq.s32.totalorder %s53_s30, 0  ;;  %p64_p10 = scmp.eq.s32.totalorder %s1963_s24, 0 }
  0x40   : > { %p2410_p3 = scmp.eq.s32.totalorder %s2037_s25, 1  ;;  %p1735_p7 = scmp.lt.s32.totalorder %s1963_s24, 2 }
  0x41   : > { %s2142_s11 = scalar_select %p54_p6, %s1959_s23, %s56_s8  }
  0x42   : > { %p2136_p5 = por %p2410_p3, %p63_p13  ;;  %p65_p9 = por %p64_p10, %p63_p13 }
  0x43   : > { %s244_s12 = sand.u32 1, %s1959_s23   ;;  %s1533_s13 = sshll.u32 %s1963_s24, 4 }
  0x44   : > { %s2411_s9 = scalar_select %p2136_p5, 1, 0 }
  0x45   : > { %s247_s10 = scalar_lea.vmem [#allocation3], %s244_s12  ;;  %s2149_s15 = scalar_lea.hbm %s2397_s1, %s1533_s13 }
  0x46   : > { %s254_s19 = sshll.u32 %s247_s10, 4  ;;  %p2153_p11 = pnand %p1735_p7, %p65_p9  ;;  %s2151_s19 = int_to_ptr.vmem [resolvable:$true] %s254_s19 }
  0x47   : > { %s245_s7 = scalar_lea.sflag [#allocation4], %s244_s12  ;;  %s1863_s17 = scalar_lea.hbm %s2149_s15, 16 }
  0x48   : > { %p1864_p12 = scmp.ne.s32.totalorder %s2149_s15, %s1863_s17  ;;  %p1865_p0 = pneg %p2153_p11 }
  0x49   : > { %s1868_s30 = scalar_lea.hbm %s2397_s1, 32  ;;  %p1869_p13 = scmp.lt.u32.totalorder %s2149_s15, %s2397_s1 }
  0x4a   : > { %p1866_p2 = pnand %p1865_p0, %p1864_p12  ;;  %p1870_p6 = scmp.lt.u32.totalorder %s1868_s30, %s1863_s17 }
  0x4b   : > { %p1872_p3 = scmp.lt.u32.totalorder %s1863_s17, %s2149_s15 }
  0x4c   : > { %p1867_p1 = pneg %p1866_p2  ;;  %p1871_p10 = por %p1870_p6, %p1869_p13 }
  0x4e   : > { %p1873_p7 = por %p1872_p3, %p1871_p10 }
  0x50   : > { %p1874_p9 = pnand %p1873_p7, %p1867_p1 }
  0x52   : > { %1877 = shalt.err (!%p1874_p9)
}
  0x53   : > { %s1878_s12 = scalar_lea.vmem %s2151_s19, 16  ;;  %s1969_s20 = smov [#allocation3]  }
  0x54   : > { %p1879_p12 = scmp.ne.s32.totalorder %s2151_s19, %s1878_s12  ;;  %s1883_s14 = sshll.u32 %s1969_s20, 4  ;;  %s1884_s14 = int_to_ptr.vmem [resolvable:$false] %s1883_s14 }
  0x55   : > { %s1885_s18 = scalar_lea.vmem %s1884_s14, 32  ;;  %p1886_p4 = scmp.lt.s32.totalorder %s2151_s19, %s1884_s14 }
  0x56   : > { %p1881_p2 = pnand %p1879_p12, %p1865_p0  ;;  %p1887_p13 = scmp.lt.s32.totalorder %s1885_s18, %s1878_s12 }
  0x58   : > { %p1882_p5 = pneg %p1881_p2  ;;  %p1888_p6 = por %p1887_p13, %p1886_p4 }
  0x5a   : > { %p1889_p10 = pnand %p1888_p6, %p1882_p5 }
  0x5c   : > { %1892 = shalt.err (!%p1889_p10)
}
  0x5d   : > { %1728 = dma.hbm_to_vmem [thread:$0]  (!%p2153_p11), %s2149_s15, 16, %s2151_s19, %s245_s7  }
  0x5e   : > { %270 = sbr.rel (%p2056_p8) target bundleno = 4123 (0x101b), region = 44  ;;  %s2185_s17 = sand.u32 (!%p2056_p8), 1, %s1955_s22  }
  0x5f   : > { %s273_s8 = scalar_lea.sflag (!%p2056_p8), [#allocation4], %s2185_s17  ;;  %s275_s30 = scalar_lea.vmem (!%p2056_p8), [#allocation3], %s2185_s17 }
  0x60   : > { %p2413_p0 = scmp.ne.s32.totalorder (!%p2056_p8), %s2406_s27, 0 }
  0x65   : > { %1938 = dma.done.wait (%p2413_p0), %s273_s8, 16  }
  0x66   : > { %1940 = vsyncadd (%p2413_p0), %s273_s8, 4294967280  ;;  %p2414_p4 = scmp.eq.s32.totalorder %s2037_s25, 0 }
  0x68   : > { %1942 = dma.done.wait (%p2414_p4), [#allocation7], 2048   ;;  %p2415_p5 = pmov %p2414_p4 }
  0x69   : > { %p319_p8 = scmp.lt.s32.totalorder %s2037_s25, 1  ;;  %v1970_v0 = vmov 0.0|0.0   ;;  %vm1971_vm0 = vmmov 0   ;;  %v1972_v1 = vmov 0.0   ;;  %v330_v2 = vld [vmem:[#allocation6] sm:$0xff]  ;;  %v331_v3 = vld [vmem:[#allocation6 + $0x8] sm:$0xff]  ;;  %v339_v9 = vlaneseq }
  0x6a   : > { %1944 = vsyncadd (%p2415_p5), [#allocation7], 4294965248  ;;  %1682 = vmatprep.subr.bf16.mxu0 %v1970_v0  ;;  %1606 = vmatprep.mubr.msk.f32.mxu0 %vm1971_vm0, %v1972_v1  ;;  %v332_v4 = vld [vmem:[#allocation6 + $0x10] sm:$0xff]  ;;  %v1683_v5 = vpack.c.bf16 %v331_v3, %v330_v2  ;;  %v333_v6 = vld [vmem:[#allocation6 + $0x18] sm:$0xff]  ;;  %vm343_vm1 = vcmask 261120   ;;  %s1973_s10 = smov 64  }
  0x6b   : > { %1609 = vmatprep.subr.mxu1 %v1972_v1  ;;  %1611 = vmatprep.mubr.msk.f32.mxu1 %vm1971_vm0, %v1972_v1  ;;  %s2205_s27 = scalar_select %p319_p8, %s2037_s25, 1  ;;  %v1686_v7 = vpack.c.bf16 %v333_v6, %v332_v4  ;;  %v2221_v10 = vshrl.u32 %v339_v9, 7  ;;  %v2227_v12 = vld [vmem:[%s2401_s5] sm:$0x3]  ;;  %vm420_vm2 = vcmask 130048   ;;  %vm503_vm3 = vcmask 64512  }
  0x6c   : > { %1684 = vmatpush3.bf16.msra.mxu0 %v1683_v5  ;;  %s1974_s12 = smov 96   ;;  %s1975_s20 = smov 80   ;;  %v2243_v20 = vld [vmem:[%s275_s30] ss:$0 sm:$0xff]  ;;  %v334_v51 = vld [vmem:[#allocation8] sm:$0xff]  ;;  %v335_v52 = vld [vmem:[#allocation8 + $0x8] sm:$0xff] }
  0x6d   : > { %s1538_s29 = sshll.u32 %s2205_s27, 3  ;;  %1685 = vmatprep.subr.bf16.mxu0 %v1970_v0  ;;  %v341_v11 = vsub.s32 0, %v2221_v10  ;;  %s1976_s14 = smov 112   ;;  %v1689_v53 = vpack.c.bf16 %v335_v52, %v334_v51  ;;  %v336_v54 = vld [vmem:[#allocation8 + $0x10] sm:$0xff]  ;;  %v337_v55 = vld [vmem:[#allocation8 + $0x18] sm:$0xff]  ;;  %vm763_vm4 = vcmask 261248  }
  0x6e   : > { %s322_s16 = scalar_lea.vmem %s2396_s0, %s1538_s29  ;;  %s1977_s18 = smov 48   ;;  %v1692_v56 = vpack.c.bf16 %v337_v55, %v336_v54  ;;  %v768_v61 = vsub.s32 1, %v2221_v10  ;;  %v1979_v62 = vmov 0  }
  0x6f   : > { %v2214_v8 = vld [vmem:[%s322_s16] sm:$0xff]  ;;  %v342_v13 = vrot.slane %v2227_v12, %v341_v11  ;;  %s1978_s8 = smov 16   ;;  %s326_s15 = scalar_lea.vmem %s2398_s2, %s1538_s29  ;;  %1785 = vset.pattern.permute.xlu1 %v1979_v62  ;;  %1786 = vset.pattern.permute.xlu0 %v1979_v62 }
  0x70   : > { %1687 = vmatpush3.bf16.msra.mxu0 %v1686_v7  ;;  %v329_v63 = vld [vmem:[%s326_s15] sm:$0xff]  ;;  %v769_v2 = vrot.slane %v2227_v12, %v768_v61  ;;  %v874_v12 = vld [vmem:[#allocation6 + $0x20] sm:$0xff]  ;;  %s1537_s16 = sshll.u32 %s2185_s17, 3  ;;  %s1559_s7 = sshll.u32 %s2037_s25, 7 }
  0x71   : > { %1688 = vmatprep.subr.bf16.mxu0 %v1970_v0  ;;  %s318_s13 = scalar_lea.vmem [#allocation9], %s1537_s16  ;;  %p2416_p1 = scmp.ne.s32.totalorder %s2411_s9, 0 }
  0x72   : > { %s1980_s25 = smov [#allocation9]  }
  0x73   : > { %1607 = vmatmul.mubr.msk.f32.vlgmr.msra.gmra.mrb[0].mxu0 %vm343_vm1, %v2214_v8  ;;  %s1897_s30 = sshll.u32 %s1980_s25, 4  ;;  %s1898_s30 = int_to_ptr.vmem [resolvable:$false] %s1897_s30 }
  0x74   : > { %1637 = vmatprep.mubr.msk.f32.mxu0 %vm1971_vm0, %v1972_v1  ;;  %1690 = vmatpush3.bf16.msra.mxu0 %v1689_v53  ;;  %s1899_s19 = scalar_lea.vmem %s1898_s30, 256 }
  0x75   : > { %1691 = vmatprep.subr.bf16.mxu0 %v1970_v0 }
  0x78   : > { %1693 = vmatpush3.bf16.msra.mxu0 %v1692_v56 }
  0x79   : > { %1651 = vmatprep.subr.mxu0 %v1972_v1 }
 0x146   : > { %v413_v14 = vpop.f32.mrb[0].mxu0 }
 0x147   : > { %v414_v15 = vadd.f32 %v413_v14, %v342_v13  ;;  %v1608_v16 = vpop.f32.mrb[1].mxu0 }
 0x149   : > { %515 = vrot.lane.b32.xlu1 %v414_v15, %s1973_s10  ;;  %418 = vrot.lane.b32.xlu0 %v414_v15, %s1974_s12 }
 0x14d   : > { %594 = vrot.lane.b32.xlu1 %v414_v15, %s1975_s20 }
 0x1bb   : > { %v419_v17 = vpop.permute.xlu0 %418  ;;  %v516_v18 = vpop.permute.xlu1 %515 }
 0x1bc   : > { %1610 = vmatpush3.xpose.msk.msra.mxu1 %vm420_vm2, %v419_v17  ;;  %v875_v17 = vld [vmem:[#allocation6 + $0x28] sm:$0xff] }
 0x1bd   : > { %1614 = vmatprep.subr.mxu1 %v1972_v1 }
 0x1bf   : > { %1612 = vmatmul.mubr.msk.f32.vlgmr.msra.gmra.mrb[0].mxu1 %vm420_vm2, %v414_v15  ;;  %v595_v30 = vpop.permute.xlu1 %594 }
 0x1c0   : > { %1615 = vmatpush3.msra.mxu1 %v516_v18  ;;  %1616 = vmatprep.mubr.msk.f32.mxu1 %vm1971_vm0, %v1972_v1  ;;  %v1695_v18 = vpack.c.bf16 %v875_v17, %v874_v12 }
 0x1c1   : > { %1619 = vmatprep.subr.mxu1 %v1972_v1 }
 0x292   : > { %v491_v19 = vpop.f32.mrb[0].mxu1 }
 0x293   : > { %v495_v21 = vmul.f32 0.25, %v491_v19  ;;  %v1613_v22 = vpop.f32.mrb[1].mxu1  ;;  %v876_v19 = vld [vmem:[#allocation6 + $0x30] sm:$0xff] }
 0x295   : > { %v502_v23 = vadd.f32 %v2243_v20, %v495_v21 }
 0x297   : > { %v504_v24 = vsel %vm503_vm3, %v502_v23, -inf }
 0x298   : > { %505 = vmax.xlane.f32.xlu0 %v504_v24 }
 0x325   : > { %v506_v25 = vpop.xlane.xlu0 %505 }
 0x326   : > { %v507_v26 = vsub.f32 %v502_v23, %v506_v25 }
 0x328   : > { %v508_v27 = vmul.f32 1.442695, %v507_v26 }
 0x32a   : > { %1787 = vpow2.f32 %v508_v27 }
 0x334   : > { %v1788_v28 = vpop.eup %1787 }
 0x335   : > { %v510_v29 = vsel %vm503_vm3, %v1788_v28, 0.0 }
 0x336   : > { %511 = vadd.xlane.f32.xlu1 %v510_v29 }
 0x347   : > { %592 = vrot.lane.b32.xlu1 %v414_v15, %s1976_s14 }
 0x3c3   : > { %v512_v31 = vpop.xlane.xlu1 %511 }
 0x3c4   : > { %1789 = vrcp.f32 %v512_v31 }
 0x3c7   : > { %v593_v34 = vpop.permute.xlu1 %592 }
 0x3ce   : > { %v1790_v32 = vpop.eup %1789 }
 0x3cf   : > { %v514_v33 = vmul.f32 %v1790_v32, %v1788_v28 }
 0x3d1   : > { %1617 = vmatmul.mubr.msk.f32.vlgmr.msra.gmra.mrb[2].mxu1 %vm503_vm3, %v514_v33  ;;  %v2301_v33 = vld [vmem:[%s2401_s5 + $0x2] sm:$0x3] }
 0x3d2   : > { %1620 = vmatpush3.xpose.msk.msra.mxu1 %vm420_vm2, %v595_v30  ;;  %1621 = vmatprep.mubr.msk.f32.mxu1 %vm1971_vm0, %v1972_v1 }
 0x3d3   : > { %1624 = vmatprep.subr.mxu1 %v1972_v1 }
 0x3d5   : > { %1622 = vmatmul.mubr.msk.f32.vlgmr.msra.gmra.mrb[4].mxu1 %vm420_vm2, %v593_v34  ;;  %v888_v34 = vrot.slane %v2301_v33, %v341_v11 }
 0x3d6   : > { %1626 = vmatprep.mubr.msk.f32.mxu1 %vm1971_vm0, %v1972_v1 }
 0x4a4   : > { %v587_v35 = vpop.f32.mrb[2].mxu1 }
 0x4a5   : > { %591 = vst.msk [vmem:[#allocation2] sm:$0xff] %vm420_vm2, %v587_v35  ;;  %v1618_v36 = vpop.f32.mrb[3].mxu1 }
 0x4a8   : > { %v666_v37 = vpop.f32.mrb[4].mxu1 }
 0x4a9   : > { %v670_v38 = vmul.f32 0.25, %v666_v37  ;;  %v1623_v39 = vpop.f32.mrb[5].mxu1 }
 0x4ab   : > { %v671_v40 = vadd.f32 %v2243_v20, %v670_v38 }
 0x4ad   : > { %v672_v41 = vsel %vm503_vm3, %v671_v40, -inf }
 0x4ae   : > { %673 = vmax.xlane.f32.xlu1 %v672_v41 }
 0x4bf   : > { %869 = vperm.xlu1 %1785, %v329_v63  }
 0x4c3   : > { %859 = vrot.lane.b32.xlu1 %v769_v2, %s1974_s12 }
 0x53b   : > { %v674_v42 = vpop.xlane.xlu1 %673 }
 0x53c   : > { %v675_v43 = vsub.f32 %v671_v40, %v674_v42 }
 0x53e   : > { %v676_v44 = vmul.f32 1.442695, %v675_v43 }
 0x53f   : > { %v2289_v22 = vpop.permute.xlu1 %869 }
 0x540   : > { %1791 = vpow2.f32 %v676_v44 }
 0x543   : > { %v860_v23 = vpop.permute.xlu1 %859 }
 0x54a   : > { %v1792_v45 = vpop.eup %1791 }
 0x54b   : > { %v678_v46 = vsel %vm503_vm3, %v1792_v45, 0.0 }
 0x54c   : > { %679 = vadd.xlane.f32.xlu0 %v678_v46 }
 0x562   : > { %683 = vrot.lane.b32.xlu0 %v414_v15, %s1977_s18 }
 0x5d9   : > { %v680_v47 = vpop.xlane.xlu0 %679 }
 0x5da   : > { %1793 = vrcp.f32 %v680_v47 }
 0x5dd   : > { %v684_v48 = vpop.permute.xlu0 %683 }
 0x5de   : > { %1625 = vmatpush3.msra.mxu1 %v684_v48 }
 0x5df   : > { %1694 = vmatprep.subr.bf16.mxu1 %v1970_v0 }
 0x5e4   : > { %v1794_v49 = vpop.eup %1793 }
 0x5e5   : > { %v682_v50 = vmul.f32 %v1794_v49, %v1792_v45 }
 0x5e7   : > { %1627 = vmatmul.mubr.msk.f32.vlgmr.msra.gmra.mrb[6].mxu1 %vm503_vm3, %v682_v50 }
 0x5e8   : > { %1648 = vmatprep.mubr.msk.f32.mxu1 %vm1971_vm0, %v1972_v1  ;;  %1696 = vmatpush3.bf16.msra.mxu1 %v1695_v18 }
 0x5e9   : > { %1697 = vmatprep.subr.bf16.mxu1 %v1970_v0 }
 0x6ba   : > { %v755_v57 = vpop.f32.mrb[6].mxu1 }
 0x6bb   : > { %760 = vrot.lane.b32.xlu0 %v755_v57, %s1978_s8  ;;  %v1628_v58 = vpop.f32.mrb[7].mxu1 }
 0x72d   : > { %v761_v59 = vpop.permute.xlu0 %760 }
 0x72e   : > { %764 = vst.msk [vmem:[#allocation2] sm:$0xff] %vm763_vm4, %v761_v59 }
 0x735   : > { %v765_v60 = vld [vmem:[#allocation2] sm:$0xff] }
 0x736   : > { %1638 = vmatmul.mubr.msk.f32.vlgmr.msra.gmra.mrb[2].mxu0 %vm343_vm1, %v765_v60 }
 0x737   : > { %1653 = vmatprep.mubr.msk.f32.mxu0 %vm1971_vm0, %v1972_v1 }
 0x809   : > { %v839_v3 = vpop.f32.mrb[2].mxu0 }
 0x80a   : > { %v840_v4 = vadd.f32 %v839_v3, %v769_v2  ;;  %v1639_v5 = vpop.f32.mrb[3].mxu0 }
 0x80c   : > { %v843_v6 = vadd.f32 %v840_v4, %v2214_v8  ;;  %v877_v8 = vld [vmem:[#allocation6 + $0x38] sm:$0xff] }
 0x80d   : > { %v1698_v21 = vpack.c.bf16 %v877_v8, %v876_v19  ;;  %v1305_v8 = vrot.slane %v2301_v33, %v768_v61 }
 0x80e   : > { %v844_v7 = vsel %vm343_vm1, %v843_v6, 0.0 }
 0x80f   : > { %845 = vadd.xlane.f32.xlu0 %v844_v7  ;;  %1699 = vmatpush3.bf16.msra.mxu1 %v1698_v21  ;;  %v880_v7 = vld [vmem:[#allocation8 + $0x28] sm:$0xff] }
 0x810   : > { %1656 = vmatprep.subr.mxu1 %v1972_v1 }
 0x89c   : > { %v846_v9 = vpop.xlane.xlu0 %845 }
 0x89d   : > { %v848_v13 = vmul.f32 0.03125, %v846_v9 }
 0x89f   : > { %v849_v14 = vsub.f32 %v843_v6, %v848_v13  ;;  %v879_v6 = vld [vmem:[#allocation8 + $0x20] sm:$0xff]  ;;  %v881_v13 = vld [vmem:[#allocation8 + $0x30] sm:$0xff] }
 0x8a0   : > { %v1701_v9 = vpack.c.bf16 %v880_v7, %v879_v6 }
 0x8a1   : > { %v850_v15 = vmul.f32 %v849_v14, %v849_v14 }
 0x8a3   : > { %v851_v16 = vsel %vm343_vm1, %v850_v15, 0.0 }
 0x8a4   : > { %852 = vadd.xlane.f32.xlu1 %v851_v16 }
 0x8b5   : > { %863 = vrot.lane.b32.xlu1 %v769_v2, %s1973_s10 }
 0x931   : > { %v853_v24 = vpop.xlane.xlu1 %852 }
 0x932   : > { %v854_v25 = vmul.f32 0.03125, %v853_v24 }
 0x934   : > { %v855_v26 = vadd.f32 1e-05, %v854_v25 }
 0x935   : > { %v864_v29 = vpop.permute.xlu1 %863 }
 0x936   : > { %1795 = vrsqrt.f32 %v855_v26 }
 0x940   : > { %v1796_v27 = vpop.eup %1795 }
 0x941   : > { %v857_v28 = vmul.f32 %v1796_v27, %v849_v14  ;;  %v882_v14 = vld [vmem:[#allocation8 + $0x38] sm:$0xff] }
 0x942   : > { %v1704_v15 = vpack.c.bf16 %v882_v14, %v881_v13 }
 0x943   : > { %v862_v30 = vmul.f32 %v860_v23, %v857_v28 }
 0x945   : > { %v866_v31 = vadd.f32 %v864_v29, %v862_v30 }
 0x947   : > { %v2292_v32 = vmul.f32 %v2289_v22, %v866_v31 }
 0x949   : > { %1649 = vmatmul.mubr.msk.f32.vlgmr.msra.gmra.mrb[8].mxu1 %vm343_vm1, %v2292_v32 }
 0x94a   : > { %1658 = vmatprep.mubr.msk.f32.mxu1 %vm1971_vm0, %v1972_v1 }
 0xa1c   : > { %v958_v35 = vpop.f32.mrb[8].mxu1 }
 0xa1d   : > { %v959_v36 = vadd.f32 %v958_v35, %v888_v34  ;;  %v1650_v37 = vpop.f32.mrb[9].mxu1 }
 0xa1f   : > { %1131 = vrot.lane.b32.xlu0 %v959_v36, %s1975_s20  ;;  %963 = vrot.lane.b32.xlu1 %v959_v36, %s1974_s12 }
 0xa23   : > { %1129 = vrot.lane.b32.xlu1 %v959_v36, %s1976_s14  ;;  %s2351_s14 = scalar_lea.hbm %s2402_s6, %s1559_s7 }
 0xa91   : > { %v964_v38 = vpop.permute.xlu1 %963  ;;  %v1132_v39 = vpop.permute.xlu0 %1131 }
 0xa92   : > { %1652 = vmatpush3.xpose.msk.msra.mxu0 %vm420_vm2, %v964_v38 }
 0xa93   : > { %1661 = vmatprep.subr.mxu0 %v1972_v1 }
 0xa95   : > { %1654 = vmatmul.mubr.msk.f32.vlgmr.msra.gmra.mrb[4].mxu0 %vm420_vm2, %v959_v36  ;;  %v1130_v11 = vpop.permute.xlu1 %1129 }
 0xa96   : > { %1662 = vmatpush3.xpose.msk.msra.mxu0 %vm420_vm2, %v1132_v39  ;;  %1663 = vmatprep.mubr.msk.f32.mxu0 %vm1971_vm0, %v1972_v1 }
 0xa97   : > { %1700 = vmatprep.subr.bf16.mxu0 %v1970_v0 }
 0xa99   : > { %1664 = vmatmul.mubr.msk.f32.vlgmr.msra.gmra.mrb[6].mxu0 %vm420_vm2, %v1130_v11 }
 0xa9a   : > { %1679 = vmatprep.mubr.msk.f32.mxu0 %vm1971_vm0, %v1972_v1  ;;  %1702 = vmatpush3.bf16.msra.mxu0 %v1701_v9 }
 0xa9b   : > { %1703 = vmatprep.subr.bf16.mxu0 %v1970_v0 }
 0xa9e   : > { %1705 = vmatpush3.bf16.msra.mxu0 %v1704_v15 }
 0xb68   : > { %v1035_v40 = vpop.f32.mrb[4].mxu0 }
 0xb69   : > { %v1039_v41 = vmul.f32 0.25, %v1035_v40  ;;  %v1655_v42 = vpop.f32.mrb[5].mxu0 }
 0xb6b   : > { %v1040_v43 = vadd.f32 %v2243_v20, %v1039_v41 }
 0xb6c   : > { %v1203_v44 = vpop.f32.mrb[6].mxu0 }
 0xb6d   : > { %v1207_v45 = vmul.f32 0.25, %v1203_v44  ;;  %v1665_v46 = vpop.f32.mrb[7].mxu0  ;;  %v1041_v47 = vsel %vm503_vm3, %v1040_v43, -inf }
 0xb6e   : > { %1042 = vmax.xlane.f32.xlu1 %v1041_v47 }
 0xb6f   : > { %v1208_v48 = vadd.f32 %v2243_v20, %v1207_v45 }
 0xb71   : > { %v1209_v49 = vsel %vm503_vm3, %v1208_v48, -inf }
 0xb72   : > { %1210 = vmax.xlane.f32.xlu0 %v1209_v49 }
 0xb88   : > { %1220 = vrot.lane.b32.xlu0 %v959_v36, %s1977_s18  ;;  %s1405_s18 = scalar_lea.sflag [#allocation5], %s2185_s17 }
 0xbfb   : > { %v1043_v50 = vpop.xlane.xlu1 %1042 }
 0xbfc   : > { %v1044_v51 = vsub.f32 %v1040_v43, %v1043_v50 }
 0xbfe   : > { %v1045_v52 = vmul.f32 1.442695, %v1044_v51 }
 0xbff   : > { %v1211_v53 = vpop.xlane.xlu0 %1210 }
 0xc00   : > { %1797 = vpow2.f32 %v1045_v52  ;;  %v1212_v54 = vsub.f32 %v1208_v48, %v1211_v53 }
 0xc02   : > { %v1213_v55 = vmul.f32 1.442695, %v1212_v54 }
 0xc03   : > { %v1221_v3 = vpop.permute.xlu0 %1220 }
 0xc04   : > { %1799 = vpow2.f32 %v1213_v55 }
 0xc0a   : > { %v1798_v56 = vpop.eup %1797 }
 0xc0b   : > { %v1047_v57 = vsel %vm503_vm3, %v1798_v56, 0.0 }
 0xc0c   : > { %1048 = vadd.xlane.f32.xlu1 %v1047_v57 }
 0xc0e   : > { %v1800_v58 = vpop.eup %1799 }
 0xc0f   : > { %v1215_v20 = vsel %vm503_vm3, %v1800_v58, 0.0 }
 0xc10   : > { %1216 = vadd.xlane.f32.xlu1 %v1215_v20 }
 0xc21   : > { %1052 = vrot.lane.b32.xlu1 %v959_v36, %s1973_s10 }
 0xc99   : > { %v1049_v59 = vpop.xlane.xlu1 %1048 }
 0xc9a   : > { %1801 = vrcp.f32 %v1049_v59 }
 0xc9d   : > { %v1217_v60 = vpop.xlane.xlu1 %1216 }
 0xc9e   : > { %1803 = vrcp.f32 %v1217_v60 }
 0xca1   : > { %v1053_v62 = vpop.permute.xlu1 %1052 }
 0xca2   : > { %1657 = vmatpush3.msra.mxu1 %v1053_v62 }
 0xca3   : > { %1666 = vmatprep.subr.mxu1 %v1972_v1 }
 0xca4   : > { %v1802_v63 = vpop.eup %1801 }
 0xca5   : > { %v1051_v2 = vmul.f32 %v1802_v63, %v1798_v56 }
 0xca7   : > { %1659 = vmatmul.mubr.msk.f32.vlgmr.msra.gmra.mrb[10].mxu1 %vm503_vm3, %v1051_v2 }
 0xca8   : > { %v1804_v4 = vpop.eup %1803  ;;  %1667 = vmatpush3.msra.mxu1 %v1221_v3  ;;  %1668 = vmatprep.mubr.msk.f32.mxu1 %vm1971_vm0, %v1972_v1 }
 0xca9   : > { %v1219_v5 = vmul.f32 %v1804_v4, %v1800_v58 }
 0xcab   : > { %1669 = vmatmul.mubr.msk.f32.vlgmr.msra.gmra.mrb[12].mxu1 %vm503_vm3, %v1219_v5 }
 0xd7a   : > { %v1124_v16 = vpop.f32.mrb[10].mxu1 }
 0xd7b   : > { %1128 = vst.msk [vmem:[#allocation2] sm:$0xff] %vm420_vm2, %v1124_v16  ;;  %v1660_v12 = vpop.f32.mrb[11].mxu1 }
 0xd7e   : > { %v1292_v17 = vpop.f32.mrb[12].mxu1 }
 0xd7f   : > { %1297 = vrot.lane.b32.xlu1 %v1292_v17, %s1978_s8  ;;  %v1670_v1 = vpop.f32.mrb[13].mxu1 }
 0xdf1   : > { %v1298_v18 = vpop.permute.xlu1 %1297 }
 0xdf2   : > { %1300 = vst.msk [vmem:[#allocation2] sm:$0xff] %vm763_vm4, %v1298_v18 }
 0xdf9   : > { %v1301_v19 = vld [vmem:[#allocation2] sm:$0xff] }
 0xdfa   : > { %1680 = vmatmul.mubr.msk.f32.vlgmr.msra.gmra.mrb[8].mxu0 %vm343_vm1, %v1301_v19 }
 0xecd   : > { %v1375_v0 = vpop.f32.mrb[8].mxu0 }
 0xece   : > { %v1376_v21 = vadd.f32 %v1375_v0, %v1305_v8  ;;  %v1681_v23 = vpop.f32.mrb[9].mxu0 }
 0xed0   : > { %v1379_v24 = vadd.f32 %v1376_v21, %v2292_v32 }
 0xed2   : > { %v1380_v25 = vsel %vm343_vm1, %v1379_v24, 0.0 }
 0xed3   : > { %1381 = vadd.xlane.f32.xlu1 %v1380_v25 }
 0xee4   : > { %1398 = vrot.lane.b32.xlu1 %v1305_v8, %s1973_s10  ;;  %s1418_s10 = sshll.u32 %s318_s13, 4  ;;  %s2353_s10 = int_to_ptr.vmem [resolvable:$true] %s1418_s10 }
 0xee5   : > { %s1893_s8 = scalar_lea.vmem %s2353_s10, 128  ;;  %p1900_p9 = scmp.lt.s32.totalorder %s2353_s10, %s1898_s30 }
 0xee6   : > { %p1894_p11 = scmp.ne.s32.totalorder %s2353_s10, %s1893_s8  ;;  %p1901_p12 = scmp.lt.s32.totalorder %s1899_s19, %s1893_s8 }
 0xee8   : > { %p1895_p3 = pnand %p1894_p11, %p2416_p1  ;;  %p1902_p2 = por %p1901_p12, %p1900_p9 }
 0xeea   : > { %p1896_p7 = pneg %p1895_p3 }
 0xeec   : > { %p1903_p13 = pnand %p1902_p2, %p1896_p7 }
 0xf60   : > { %v1382_v26 = vpop.xlane.xlu1 %1381 }
 0xf61   : > { %v1383_v27 = vmul.f32 0.03125, %v1382_v26 }
 0xf63   : > { %v1384_v28 = vsub.f32 %v1379_v24, %v1383_v27 }
 0xf64   : > { %v1399_v35 = vpop.permute.xlu1 %1398 }
 0xf65   : > { %v1385_v29 = vmul.f32 %v1384_v28, %v1384_v28 }
 0xf67   : > { %v1386_v10 = vsel %vm343_vm1, %v1385_v29, 0.0 }
 0xf68   : > { %1387 = vadd.xlane.f32.xlu0 %v1386_v10 }
 0xf7e   : > { %1394 = vrot.lane.b32.xlu0 %v1305_v8, %s1974_s12 }
 0xff5   : > { %v1388_v61 = vpop.xlane.xlu0 %1387 }
 0xff6   : > { %v1389_v30 = vmul.f32 0.03125, %v1388_v61 }
 0xff8   : > { %v1390_v31 = vadd.f32 1e-05, %v1389_v30 }
 0xff9   : > { %v1395_v33 = vpop.permute.xlu0 %1394 }
 0xffa   : > { %1805 = vrsqrt.f32 %v1390_v31 }
0x1004   : > { %v1806_v32 = vpop.eup %1805 }
0x1005   : > { %v1392_v34 = vmul.f32 %v1806_v32, %v1384_v28 }
0x1007   : > { %v1397_v36 = vmul.f32 %v1395_v33, %v1392_v34 }
0x1009   : > { %v1401_v37 = vadd.f32 %v1399_v35, %v1397_v36 }
0x100b   : > { %v1402_v38 = vmul.f32 %v1401_v37, %v2289_v22 }
0x100d   : > { %1403 = vst.msk [vmem:[%s318_s13] sm:$0xff] %vm343_vm1, %v1402_v38 }
0x100e   : > { %1906 = shalt.err (!%p1903_p13)
}
0x100f   : > { %s1907_s17 = scalar_lea.hbm %s2351_s14, 128  ;;  %s1911_s29 = scalar_lea.hbm %s2402_s6, 256 }
0x1010   : > { %p1908_p6 = scmp.ne.s32.totalorder %s2351_s14, %s1907_s17  ;;  %p1912_p4 = scmp.lt.u32.totalorder %s2351_s14, %s2402_s6 }
0x1011   : > { %p1913_p5 = scmp.lt.u32.totalorder %s1911_s29, %s1907_s17  ;;  %p1915_p11 = scmp.lt.u32.totalorder %s1907_s17, %s2351_s14 }
0x1012   : > { %p1909_p10 = pnand %p1908_p6, %p2416_p1 }
0x1013   : > { %p1914_p8 = por %p1913_p5, %p1912_p4 }
0x1014   : > { %p1910_p0 = pneg %p1909_p10 }
0x1015   : > { %p1916_p3 = por %p1915_p11, %p1914_p8 }
0x1017   : > { %p1917_p7 = pnand %p1916_p3, %p1910_p0 }
0x1019   : > { %1920 = shalt.err (!%p1917_p7)
}
0x101a   : > { %1716 = dma.vmem_to_hbm [thread:$0]  (%p2416_p1), %s2353_s10, 128, %s2351_s14, %s1405_s18  }
0x101b PF: > { %s1430_s13 = sand.u32 1, %s1951_s21   ;;  %p2417_p9 = scmp.ne.s32.totalorder %s2407_s28, 0 }
0x101c   : > { %p2418_p12 = scmp.ge.s32.totalorder %s1963_s24, 2  ;;  %s1431_s20 = scalar_lea.sflag [#allocation5], %s1430_s13 }
0x101e   : > { %p1730_p2 = pnand %p2418_p12, %p2417_p9 }
0x1020   : > { %1946 = dma.done.wait (!%p1730_p2), %s1431_s20, 128  }
0x1021   : > { %1948 = vsyncadd (!%p1730_p2), %s1431_s20, 4294967168  ;;  %p20_p13 = scmp.ge.s32.totalorder %s2126_s26, 4   ;;  %s2419_s21 = smov %s1955_s22 }
0x1022   : > { %s2420_s22 = smov %s1959_s23  ;;  %s2421_s23 = smov %s2142_s11 }
0x1023   : > { %s2422_s24 = smov %s2126_s26  ;;  %22 = sbr.rel (!%p20_p13) target bundleno = 6 (0x6), region = 106 }
0x102a   :  { %1436 = vsyncpa [#allocation4], 1 }
0x102b   :  { %1438 = vsyncpa [#allocation4 + $0x1], 1 }
0x102c   :  { %1439 = vsyncpa [#allocation7], 1 }
0x102d   :  { %1440 = vsyncpa [#allocation5], 1 }
0x102e   :  { %1442 = vsyncpa [#allocation5 + $0x1], 1 }

</bundles_post_ra>
